<compile_context>
chip_gen: v6e
topology: v6e:2x2x1
jax: 0.10.0
libtpu: 0.0.40
codegen_flags: <defaults>
</compile_context>

<pallas_src>
import jax
import jax.numpy as jnp
from jax.experimental import pallas as pl
from jax.experimental.pallas import tpu as pltpu

_LANE = 128
_SUBLANE = 8
_H1_PAD = 128   # true hidden-1 width is 50
_H2_PAD = 128   # true hidden-2 width is 25


def _round_up(x, m):
    return ((x + m - 1) // m) * m


def mlp_kernel(x_ref, w1_ref, b1_ref, w2_ref, b2_ref, w3_ref, b3_ref, o_ref):
    # One batch tile per grid step; weights/biases stay VMEM-resident
    # (constant index_map) across all steps.
    x = x_ref[...]                                                    # [T, F]

    h1 = jnp.dot(x, w1_ref[...], preferred_element_type=jnp.float32)
    h1 = jnp.maximum(h1 + b1_ref[...], 0.0)                           # [T, 128]

    h2 = jnp.dot(h1, w2_ref[...], preferred_element_type=jnp.float32)
    h2 = jnp.maximum(h2 + b2_ref[...], 0.0)                           # [T, 128]

    logits = jnp.dot(h2, w3_ref[...], preferred_element_type=jnp.float32)
    o_ref[...] = (logits + b3_ref[...]).astype(o_ref.dtype)           # [T, C]


def prepare_params(params, num_features, num_classes):
    """One-time preprocessing: transpose torch (out,in) weights to (in,out)
    and zero-pad hidden widths to lane-dense 128.  The class dimension is NOT
    padded (small-C output is written unpadded to cut HBM writeback)."""
    def pad2(a, rows, cols):
        out = jnp.zeros((rows, cols), jnp.float32)
        return out.at[: a.shape[0], : a.shape[1]].set(a.astype(jnp.float32))

    w1 = pad2(params["w1"].T, num_features, _H1_PAD)
    w2 = pad2(params["w2"].T, _H1_PAD, _H2_PAD)
    w3 = pad2(params["w3"].T, _H2_PAD, num_classes)          # rows padded only
    b1 = pad2(params["b1"].reshape(1, -1), 1, _H1_PAD)
    b2 = pad2(params["b2"].reshape(1, -1), 1, _H2_PAD)
    b3 = params["b3"].reshape(1, -1).astype(jnp.float32)     # (1, num_classes)
    return dict(w1=w1, b1=b1, w2=w2, b2=b2, w3=w3, b3=b3)


def _vmem_budgets():
    """Per-generation budgets: (single-copy x+out byte budget, scoped VMEM limit)."""
    try:
        cap = int(getattr(pltpu.get_tpu_info(), "vmem_capacity_bytes"))
    except Exception:
        cap = 64 * 1024 * 1024                      # conservative (v7x per-TC size)
    # Scoped limit ~3/4 of physical, capped at 64 MiB (v7x: 48/64, v5e/v6e: 64/128).
    vmem_limit = min((3 * cap) // 4, 64 * 1024 * 1024)
    # Pallas double-buffers x and out, so the streaming working set is ~2x this
    # plus ~0.2 MiB of resident weights -> well under vmem_limit everywhere.
    tile_budget = min(16 * 1024 * 1024, vmem_limit // 4)
    return tile_budget, vmem_limit


def _choose_tile_n(n, num_features, num_classes, budget_bytes):
    """Largest multiple-of-8 batch tile whose x+out rows fit budget_bytes,
    capped so the grid has >=2 (target 4) steps when the batch allows
    (megacore + pipeline overlap), splitting the batch nearly evenly."""
    per_row_bytes = (num_features + num_classes) * 4
    tile_max = max(_SUBLANE, (budget_bytes // per_row_bytes) // _SUBLANE * _SUBLANE)
    n8 = _round_up(n, _SUBLANE)
    min_tiles = max(1, min(4, n8 // _SUBLANE))
    num_tiles = max(pl.cdiv(n8, tile_max), min_tiles)
    tile = _round_up(pl.cdiv(n8, num_tiles), _SUBLANE)
    return int(min(tile, n8))


@jax.jit
def pytorch_mlp_forward(x_nchw, prepped):
    """x_nchw: [N, ...] float32 (any trailing dims). prepped: prepare_params()."""
    n = x_nchw.shape[0]
    x = x_nchw.reshape(n, -1).astype(jnp.float32)       # flatten(start_dim=1)
    num_features = x.shape[1]
    num_classes = prepped["w3"].shape[1]

    tile_budget, vmem_limit = _vmem_budgets()
    tile_n = _choose_tile_n(n, num_features, num_classes, tile_budget)
    grid = (pl.cdiv(n, tile_n),)

    n_work = grid[0] * tile_n
    flops = 2 * n_work * (num_features * _H1_PAD + _H1_PAD * _H2_PAD
                          + _H2_PAD * num_classes)
    bytes_accessed = (n * num_features * 4 + n * num_classes * 4
                      + sum(int(v.size) * 4 for v in prepped.values()))

    return pl.pallas_call(
        mlp_kernel,
        out_shape=jax.ShapeDtypeStruct((n, num_classes), jnp.float32),
        grid=grid,
        in_specs=[
            pl.BlockSpec((tile_n, num_features), lambda i: (i, 0)),    # x tile (streamed)
            pl.BlockSpec((num_features, _H1_PAD), lambda i: (0, 0)),   # w1 (resident)
            pl.BlockSpec((1, _H1_PAD), lambda i: (0, 0)),              # b1
            pl.BlockSpec((_H1_PAD, _H2_PAD), lambda i: (0, 0)),        # w2
            pl.BlockSpec((1, _H2_PAD), lambda i: (0, 0)),              # b2
            pl.BlockSpec((_H2_PAD, num_classes), lambda i: (0, 0)),    # w3
            pl.BlockSpec((1, num_classes), lambda i: (0, 0)),          # b3
        ],
        out_specs=pl.BlockSpec((tile_n, num_classes), lambda i: (i, 0)),
        compiler_params=pltpu.CompilerParams(
            dimension_semantics=("parallel",),        # megacore sharding on v7x
            vmem_limit_bytes=int(vmem_limit),
        ),
        cost_estimate=pl.CostEstimate(
            flops=int(flops), transcendentals=0, bytes_accessed=int(bytes_accessed)
        ),
    )(x, prepped["w1"], prepped["b1"], prepped["w2"], prepped["b2"],
      prepped["w3"], prepped["b3"])


def init_params(key, num_features, num_classes):
    """Deterministic init mimicking torch.nn.Linear default (uniform +/- 1/sqrt(fan_in))."""
    def linear_init(k, fan_in, fan_out):
        kw, kb = jax.random.split(k)
        bound = 1.0 / jnp.sqrt(fan_in)
        w = jax.random.uniform(kw, (fan_out, fan_in), jnp.float32, -bound, bound)
        b = jax.random.uniform(kb, (fan_out,), jnp.float32, -bound, bound)
        return w, b

    k1, k2, k3 = jax.random.split(key, 3)
    w1, b1 = linear_init(k1, num_features, 50)
    w2, b2 = linear_init(k2, 50, 25)
    w3, b3 = linear_init(k3, 25, num_classes)
    return dict(w1=w1, b1=b1, w2=w2, b2=b2, w3=w3, b3=b3)


def reference_forward(x_nchw, params):
    x = x_nchw.reshape(x_nchw.shape[0], -1)
    h1 = jnp.maximum(x @ params["w1"].T + params["b1"], 0.0)
    h2 = jnp.maximum(h1 @ params["w2"].T + params["b2"], 0.0)
    return h2 @ params["w3"].T + params["b3"]


if __name__ == "__main__":
    # Small shapes consistent with the module: batch=8, C=1, H=W=8 -> num_features=64.
    batch, c, h, w = 8, 1, 8, 8
    num_features = c * h * w
    num_classes = 10

    key = jax.random.PRNGKey(0)
    kx, kp = jax.random.split(key)
    x = jax.random.normal(kx, (batch, c, h, w), jnp.float32)
    params = init_params(kp, num_features, num_classes)

    prepped = prepare_params(params, num_features, num_classes)  # one-time prep
    out = jax.block_until_ready(pytorch_mlp_forward(x, prepped))

    ref = reference_forward(x, params)
    assert out.shape == (batch, num_classes)
    assert jnp.allclose(out, ref, atol=1e-5, rtol=1e-5), "mismatch vs JAX reference"

    print("KERNEL_OK")
</pallas_src>

<mosaic_0001>
module attributes {stable_mosaic.version = 11 : i64} {
  func.func @mlp_kernel(%arg0: i32, %arg1: memref<8x64xf32, #tpu.memory_space<vmem>>, %arg2: memref<64x128xf32, #tpu.memory_space<vmem>>, %arg3: memref<1x128xf32, #tpu.memory_space<vmem>>, %arg4: memref<128x128xf32, #tpu.memory_space<vmem>>, %arg5: memref<1x128xf32, #tpu.memory_space<vmem>>, %arg6: memref<128x10xf32, #tpu.memory_space<vmem>>, %arg7: memref<1x10xf32, #tpu.memory_space<vmem>>, %arg8: memref<8x10xf32, #tpu.memory_space<vmem>>) attributes {dimension_semantics = [#tpu.dimension_semantics<parallel>], iteration_bounds = array<i64: 1>, scalar_prefetch = 0 : i64, scratch_operands = 0 : i64, tpu.core_type = #tpu.core_type<tc>, window_params = [{transform_indices = @transform_0, window_bounds = array<i64: 8, 64>}, {pipeline_mode = #tpu.pipeline_mode<synchronous>, transform_indices = @transform_1, window_bounds = array<i64: 64, 128>}, {pipeline_mode = #tpu.pipeline_mode<synchronous>, transform_indices = @transform_2, window_bounds = array<i64: 1, 128>}, {pipeline_mode = #tpu.pipeline_mode<synchronous>, transform_indices = @transform_3, window_bounds = array<i64: 128, 128>}, {pipeline_mode = #tpu.pipeline_mode<synchronous>, transform_indices = @transform_4, window_bounds = array<i64: 1, 128>}, {pipeline_mode = #tpu.pipeline_mode<synchronous>, transform_indices = @transform_5, window_bounds = array<i64: 128, 10>}, {pipeline_mode = #tpu.pipeline_mode<synchronous>, transform_indices = @transform_6, window_bounds = array<i64: 1, 10>}, {transform_indices = @transform_7, window_bounds = array<i64: 8, 10>}]} {
    %c0 = arith.constant 0 : index
    %c0_0 = arith.constant 0 : index
    %0 = vector.load %arg1[%c0, %c0_0] : memref<8x64xf32, #tpu.memory_space<vmem>>, vector<8x64xf32>
    %c0_1 = arith.constant 0 : index
    %c0_2 = arith.constant 0 : index
    %1 = vector.load %arg2[%c0_1, %c0_2] : memref<64x128xf32, #tpu.memory_space<vmem>>, vector<64x128xf32>
    %cst = arith.constant dense<0.000000e+00> : vector<8x128xf32>
    %2 = tpu.matmul %0, %1, %cst {dimension_numbers = #tpu.dot_dimension_numbers<[1], [0], [0], [1], [0, 0, 1, 1], [], []>} : vector<8x64xf32>, vector<64x128xf32>, vector<8x128xf32> -> vector<8x128xf32>
    %c0_3 = arith.constant 0 : index
    %c0_4 = arith.constant 0 : index
    %3 = vector.load %arg3[%c0_3, %c0_4] : memref<1x128xf32, #tpu.memory_space<vmem>>, vector<1x128xf32>
    %4 = vector.broadcast %3 : vector<1x128xf32> to vector<8x128xf32>
    %5 = arith.addf %2, %4 : vector<8x128xf32>
    %cst_5 = arith.constant 0.000000e+00 : f32
    %6 = vector.broadcast %cst_5 : f32 to vector<8x128xf32>
    %7 = arith.maximumf %5, %6 : vector<8x128xf32>
    %c0_6 = arith.constant 0 : index
    %c0_7 = arith.constant 0 : index
    %8 = vector.load %arg4[%c0_6, %c0_7] : memref<128x128xf32, #tpu.memory_space<vmem>>, vector<128x128xf32>
    %cst_8 = arith.constant dense<0.000000e+00> : vector<8x128xf32>
    %9 = tpu.matmul %7, %8, %cst_8 {dimension_numbers = #tpu.dot_dimension_numbers<[1], [0], [0], [1], [0, 0, 1, 1], [], []>} : vector<8x128xf32>, vector<128x128xf32>, vector<8x128xf32> -> vector<8x128xf32>
    %c0_9 = arith.constant 0 : index
    %c0_10 = arith.constant 0 : index
    %10 = vector.load %arg5[%c0_9, %c0_10] : memref<1x128xf32, #tpu.memory_space<vmem>>, vector<1x128xf32>
    %11 = vector.broadcast %10 : vector<1x128xf32> to vector<8x128xf32>
    %12 = arith.addf %9, %11 : vector<8x128xf32>
    %cst_11 = arith.constant 0.000000e+00 : f32
    %13 = vector.broadcast %cst_11 : f32 to vector<8x128xf32>
    %14 = arith.maximumf %12, %13 : vector<8x128xf32>
    %c0_12 = arith.constant 0 : index
    %c0_13 = arith.constant 0 : index
    %15 = vector.load %arg6[%c0_12, %c0_13] : memref<128x10xf32, #tpu.memory_space<vmem>>, vector<128x10xf32>
    %cst_14 = arith.constant dense<0.000000e+00> : vector<8x10xf32>
    %16 = tpu.matmul %14, %15, %cst_14 {dimension_numbers = #tpu.dot_dimension_numbers<[1], [0], [0], [1], [0, 0, 1, 1], [], []>} : vector<8x128xf32>, vector<128x10xf32>, vector<8x10xf32> -> vector<8x10xf32>
    %c0_15 = arith.constant 0 : index
    %c0_16 = arith.constant 0 : index
    %17 = vector.load %arg7[%c0_15, %c0_16] : memref<1x10xf32, #tpu.memory_space<vmem>>, vector<1x10xf32>
    %18 = vector.broadcast %17 : vector<1x10xf32> to vector<8x10xf32>
    %19 = arith.addf %16, %18 : vector<8x10xf32>
    %c0_17 = arith.constant 0 : index
    %c0_18 = arith.constant 0 : index
    %20 = vector.load %arg8[%c0_17, %c0_18] : memref<8x10xf32, #tpu.memory_space<vmem>>, vector<8x10xf32>
    tpu.vector_store %arg8[%c0_17, %c0_18], %19 {strides = array<i32>} : memref<8x10xf32, #tpu.memory_space<vmem>>, vector<8x10xf32>,
    return
  }
  func.func @transform_0(%arg0: i32) -> (i32, i32) {
    %c0_i32 = arith.constant 0 : i32
    %c0_i32_0 = arith.constant 0 : i32
    return %arg0, %c0_i32 : i32, i32
  }
  func.func @transform_1(%arg0: i32) -> (i32, i32) {
    %c0_i32 = arith.constant 0 : i32
    %c0_i32_0 = arith.constant 0 : i32
    %c0_i32_1 = arith.constant 0 : i32
    return %c0_i32, %c0_i32_0 : i32, i32
  }
  func.func @transform_2(%arg0: i32) -> (i32, i32) {
    %c0_i32 = arith.constant 0 : i32
    %c0_i32_0 = arith.constant 0 : i32
    %c0_i32_1 = arith.constant 0 : i32
    return %c0_i32, %c0_i32_0 : i32, i32
  }
  func.func @transform_3(%arg0: i32) -> (i32, i32) {
    %c0_i32 = arith.constant 0 : i32
    %c0_i32_0 = arith.constant 0 : i32
    %c0_i32_1 = arith.constant 0 : i32
    return %c0_i32, %c0_i32_0 : i32, i32
  }
  func.func @transform_4(%arg0: i32) -> (i32, i32) {
    %c0_i32 = arith.constant 0 : i32
    %c0_i32_0 = arith.constant 0 : i32
    %c0_i32_1 = arith.constant 0 : i32
    return %c0_i32, %c0_i32_0 : i32, i32
  }
  func.func @transform_5(%arg0: i32) -> (i32, i32) {
    %c0_i32 = arith.constant 0 : i32
    %c0_i32_0 = arith.constant 0 : i32
    %c0_i32_1 = arith.constant 0 : i32
    return %c0_i32, %c0_i32_0 : i32, i32
  }
  func.func @transform_6(%arg0: i32) -> (i32, i32) {
    %c0_i32 = arith.constant 0 : i32
    %c0_i32_0 = arith.constant 0 : i32
    %c0_i32_1 = arith.constant 0 : i32
    return %c0_i32, %c0_i32_0 : i32, i32
  }
  func.func @transform_7(%arg0: i32) -> (i32, i32) {
    %c0_i32 = arith.constant 0 : i32
    %c0_i32_0 = arith.constant 0 : i32
    return %arg0, %c0_i32 : i32, i32
  }
}

</mosaic_0001>

<bundles_post_ra>
// kernel: pytorch_mlp_forward.1
= control target key start
LH: loop header
LB: loop body
LE: loop exit
PB: predicated region body
PF: predicated region fallthrough
CT: control target
= control target key end

     0   :  { %v482_v1 = vmov 0.0   ;;  %vm483_vm0 = vmmov 0   ;;  %s706_s0 = inlined_call_operand.vmem [shape: f32[8,64], index: 0, kind: input, shape index: {}]   ;;  %s707_s1 = inlined_call_operand.vmem [shape: f32[64,128], index: 1, kind: input, shape index: {}]   ;;  %s708_s2 = inlined_call_operand.vmem [shape: f32[1,128], index: 2, kind: input, shape index: {}]   ;;  %s709_s3 = inlined_call_operand.vmem [shape: f32[128,128], index: 3, kind: input, shape index: {}]   ;;  %s710_s4 = inlined_call_operand.vmem [shape: f32[1,128], index: 4, kind: input, shape index: {}]   ;;  %s711_s5 = inlined_call_operand.vmem [shape: f32[128,10], index: 5, kind: input, shape index: {}]   ;;  %s712_s6 = inlined_call_operand.vmem [shape: f32[1,10], index: 6, kind: input, shape index: {}]   ;;  %s713_s7 = inlined_call_operand.hbm [shape: f32[8,10], index: 7, kind: output, shape index: {}]  }
   0x1   :  { %v35_v0 = vld [vmem:[%s707_s1 + $0x38] sm:$0xff]  ;;  %368 = vmatprep.subr.mxu0 %v482_v1  ;;  %v34_v2 = vld [vmem:[%s707_s1 + $0x30] sm:$0xff]  ;;  %384 = vmatprep.mubr.msk.f32.mxu0 %vm483_vm0, %v482_v1  ;;  %v33_v3 = vld [vmem:[%s707_s1 + $0x28] sm:$0xff] }
   0x2   :  { %369 = vmatpush3.msra.mxu0 %v35_v0  ;;  %387 = vmatprep.subr.mxu1 %v482_v1  ;;  %v133_v4 = vld [vmem:[%s709_s3 + $0x78] sm:$0xff]  ;;  %v132_v5 = vld [vmem:[%s709_s3 + $0x70] sm:$0xff]  ;;  %v32_v6 = vld [vmem:[%s707_s1 + $0x20] sm:$0xff] }
   0x3   :  { %370 = vmatprep.subr.mxu0 %v482_v1  ;;  %419 = vmatprep.mubr.msk.f32.mxu1 %vm483_vm0, %v482_v1  ;;  %v131_v7 = vld [vmem:[%s709_s3 + $0x68] sm:$0xff]  ;;  %v31_v8 = vld [vmem:[%s707_s1 + $0x18] sm:$0xff]  ;;  %v130_v9 = vld [vmem:[%s709_s3 + $0x60] sm:$0xff] }
   0x4   :  { %371 = vmatpush3.msra.mxu0 %v34_v2  ;;  %388 = vmatpush3.msra.mxu1 %v133_v4 }
   0x5   :  { %372 = vmatprep.subr.mxu0 %v482_v1  ;;  %389 = vmatprep.subr.mxu1 %v482_v1 }
   0x6   :  { %373 = vmatpush3.msra.mxu0 %v33_v3  ;;  %390 = vmatpush3.msra.mxu1 %v132_v5 }
   0x7   :  { %374 = vmatprep.subr.mxu0 %v482_v1  ;;  %391 = vmatprep.subr.mxu1 %v482_v1 }
   0x8   :  { %12 = vsyncpa [#allocation3], 0  ;;  %375 = vmatpush3.msra.mxu0 %v32_v6  ;;  %392 = vmatpush3.msra.mxu1 %v131_v7  ;;  %v30_v10 = vld [vmem:[%s707_s1 + $0x10] sm:$0xff]  ;;  %v129_v11 = vld [vmem:[%s709_s3 + $0x58] sm:$0xff]  ;;  %vm43_vm1 = vcmask 523264   ;;  %s484_s12 = smov [#allocation2]  }
   0x9   :  { %376 = vmatprep.subr.mxu0 %v482_v1  ;;  %393 = vmatprep.subr.mxu1 %v482_v1  ;;  %v29_v12 = vld [vmem:[%s707_s1 + $0x8] sm:$0xff]  ;;  %v128_v13 = vld [vmem:[%s709_s3 + $0x50] sm:$0xff]  ;;  %v28_v14 = vld [vmem:[%s707_s1] sm:$0xff]  ;;  %vm305_vm2 = vcmask 80896  }
   0xa   :  { %377 = vmatpush3.msra.mxu0 %v31_v8  ;;  %394 = vmatpush3.msra.mxu1 %v130_v9  ;;  %v127_v15 = vld [vmem:[%s709_s3 + $0x48] sm:$0xff]  ;;  %v27_v16 = vld [vmem:[%s706_s0] sm:$0xff]  ;;  %v125_v18 = vld [vmem:[%s709_s3 + $0x38] sm:$0xff]  ;;  %s313_s0 = sshll.u32 %s484_s12, 4  ;;  %s314_s0 = int_to_ptr.vmem [resolvable:$true] %s313_s0 }
   0xb   :  { %378 = vmatprep.subr.mxu0 %v482_v1  ;;  %395 = vmatprep.subr.mxu1 %v482_v1  ;;  %v126_v17 = vld [vmem:[%s709_s3 + $0x40] sm:$0xff]  ;;  %v124_v19 = vld [vmem:[%s709_s3 + $0x30] sm:$0xff]  ;;  %v123_v20 = vld [vmem:[%s709_s3 + $0x28] sm:$0xff]  ;;  %p465_p1 = scmp.lt.s32.totalorder %s314_s0, %s314_s0 }
   0xc   :  { %379 = vmatpush3.msra.mxu0 %v30_v10  ;;  %396 = vmatpush3.msra.mxu1 %v129_v11  ;;  %v122_v21 = vld [vmem:[%s709_s3 + $0x20] sm:$0xff]  ;;  %v121_v22 = vld [vmem:[%s709_s3 + $0x18] sm:$0xff]  ;;  %v120_v23 = vld [vmem:[%s709_s3 + $0x10] sm:$0xff] }
   0xd   :  { %380 = vmatprep.subr.mxu0 %v482_v1  ;;  %397 = vmatprep.subr.mxu1 %v482_v1  ;;  %v119_v24 = vld [vmem:[%s709_s3 + $0x8] sm:$0xff]  ;;  %v118_v25 = vld [vmem:[%s709_s3] sm:$0xff]  ;;  %v227_v26 = vld [vmem:[%s711_s5 + $0x78] sm:$0xff] }
   0xe   :  { %381 = vmatpush3.msra.mxu0 %v29_v12  ;;  %398 = vmatpush3.msra.mxu1 %v128_v13  ;;  %v226_v27 = vld [vmem:[%s711_s5 + $0x70] sm:$0xff]  ;;  %v225_v28 = vld [vmem:[%s711_s5 + $0x68] sm:$0xff]  ;;  %v224_v29 = vld [vmem:[%s711_s5 + $0x60] sm:$0xff] }
   0xf   :  { %382 = vmatprep.subr.mxu0 %v482_v1  ;;  %399 = vmatprep.subr.mxu1 %v482_v1  ;;  %v223_v30 = vld [vmem:[%s711_s5 + $0x58] sm:$0xff]  ;;  %v222_v31 = vld [vmem:[%s711_s5 + $0x50] sm:$0xff]  ;;  %v221_v32 = vld [vmem:[%s711_s5 + $0x48] sm:$0xff] }
  0x10   :  { %383 = vmatpush3.msra.mxu0 %v28_v14  ;;  %400 = vmatpush3.msra.mxu1 %v127_v15  ;;  %v220_v33 = vld [vmem:[%s711_s5 + $0x40] sm:$0xff]  ;;  %v219_v34 = vld [vmem:[%s711_s5 + $0x38] sm:$0xff]  ;;  %v218_v35 = vld [vmem:[%s711_s5 + $0x30] sm:$0xff] }
  0x11   :  { %385 = vmatmul.mubr.msk.f32.vlgmr.msra.gmra.mxu0 %vm43_vm1, %v27_v16  ;;  %401 = vmatprep.subr.mxu1 %v482_v1  ;;  %v217_v36 = vld [vmem:[%s711_s5 + $0x28] sm:$0xff]  ;;  %v216_v37 = vld [vmem:[%s711_s5 + $0x20] sm:$0xff]  ;;  %v215_v38 = vld [vmem:[%s711_s5 + $0x18] sm:$0xff] }
  0x12   :  { %402 = vmatpush3.msra.mxu1 %v126_v17  ;;  %422 = vmatprep.subr.mxu0 %v482_v1  ;;  %v321_v39 = vld [vmem:[%s708_s2] ss:$0 sm:$0xff]  ;;  %v214_v44 = vld [vmem:[%s711_s5 + $0x10] sm:$0xff]  ;;  %v213_v45 = vld [vmem:[%s711_s5 + $0x8] sm:$0xff] }
  0x13   :  { %403 = vmatprep.subr.mxu1 %v482_v1  ;;  %454 = vmatprep.mubr.msk.f32.mxu0 %vm483_vm0, %v482_v1  ;;  %v212_v46 = vld [vmem:[%s711_s5] sm:$0xff]  ;;  %s460_s5 = scalar_lea.vmem %s314_s0, 128 }
  0x14   :  { %404 = vmatpush3.msra.mxu1 %v125_v18  ;;  %423 = vmatpush3.msra.mxu0 %v227_v26  ;;  %v323_v47 = vld [vmem:[%s710_s4] ss:$0 sm:$0xff]  ;;  %p461_p0 = scmp.ne.s32.totalorder %s314_s0, %s460_s5  ;;  %p466_p2 = scmp.lt.s32.totalorder %s460_s5, %s460_s5 }
  0x15   :  { %405 = vmatprep.subr.mxu1 %v482_v1  ;;  %424 = vmatprep.subr.mxu0 %v482_v1  ;;  %v324_v52 = vld [vmem:[%s712_s6] ss:$0 sm:$0xff] }
  0x16   :  { %406 = vmatpush3.msra.mxu1 %v124_v19  ;;  %425 = vmatpush3.msra.mxu0 %v226_v27  ;;  %p467_p3 = por %p466_p2, %p465_p1 }
  0x17   :  { %407 = vmatprep.subr.mxu1 %v482_v1  ;;  %426 = vmatprep.subr.mxu0 %v482_v1 }
  0x18   :  { %408 = vmatpush3.msra.mxu1 %v123_v20  ;;  %427 = vmatpush3.msra.mxu0 %v225_v28  ;;  %p468_p4 = pnand %p467_p3, %p461_p0 }
  0x19   :  { %409 = vmatprep.subr.mxu1 %v482_v1  ;;  %428 = vmatprep.subr.mxu0 %v482_v1 }
  0x1a   :  { %410 = vmatpush3.msra.mxu1 %v122_v21  ;;  %429 = vmatpush3.msra.mxu0 %v224_v29 }
  0x1b   :  { %411 = vmatprep.subr.mxu1 %v482_v1  ;;  %430 = vmatprep.subr.mxu0 %v482_v1 }
  0x1c   :  { %412 = vmatpush3.msra.mxu1 %v121_v22  ;;  %431 = vmatpush3.msra.mxu0 %v223_v30 }
  0x1d   :  { %413 = vmatprep.subr.mxu1 %v482_v1  ;;  %432 = vmatprep.subr.mxu0 %v482_v1 }
  0x1e   :  { %414 = vmatpush3.msra.mxu1 %v120_v23  ;;  %433 = vmatpush3.msra.mxu0 %v222_v31 }
  0x1f   :  { %415 = vmatprep.subr.mxu1 %v482_v1  ;;  %434 = vmatprep.subr.mxu0 %v482_v1 }
  0x20   :  { %416 = vmatpush3.msra.mxu1 %v119_v24  ;;  %435 = vmatpush3.msra.mxu0 %v221_v32 }
  0x21   :  { %417 = vmatprep.subr.mxu1 %v482_v1  ;;  %436 = vmatprep.subr.mxu0 %v482_v1 }
  0x22   :  { %418 = vmatpush3.msra.mxu1 %v118_v25  ;;  %437 = vmatpush3.msra.mxu0 %v220_v33 }
  0x23   :  { %438 = vmatprep.subr.mxu0 %v482_v1 }
  0x24   :  { %439 = vmatpush3.msra.mxu0 %v219_v34 }
  0x25   :  { %440 = vmatprep.subr.mxu0 %v482_v1 }
  0x26   :  { %441 = vmatpush3.msra.mxu0 %v218_v35 }
  0x27   :  { %442 = vmatprep.subr.mxu0 %v482_v1 }
  0x28   :  { %443 = vmatpush3.msra.mxu0 %v217_v36 }
  0x29   :  { %444 = vmatprep.subr.mxu0 %v482_v1 }
  0x2a   :  { %445 = vmatpush3.msra.mxu0 %v216_v37 }
  0x2b   :  { %446 = vmatprep.subr.mxu0 %v482_v1 }
  0x2c   :  { %447 = vmatpush3.msra.mxu0 %v215_v38 }
  0x2d   :  { %448 = vmatprep.subr.mxu0 %v482_v1 }
  0x2e   :  { %449 = vmatpush3.msra.mxu0 %v214_v44 }
  0x2f   :  { %450 = vmatprep.subr.mxu0 %v482_v1 }
  0x30   :  { %451 = vmatpush3.msra.mxu0 %v213_v45 }
  0x31   :  { %452 = vmatprep.subr.mxu0 %v482_v1 }
  0x32   :  { %453 = vmatpush3.msra.mxu0 %v212_v46 }
  0xd1   :  { %v113_v40 = vpop.f32.mrf.mxu0 }
  0xd2   :  { %v114_v41 = vadd.f32 %v321_v39, %v113_v40 }
  0xd3   :  { %v386_v42 = vpop.f32.mrf.mxu0 }
  0xd4   :  { %v117_v43 = vmax.f32 %v114_v41, 0.0 }
  0xd6   :  { %420 = vmatmul.mubr.f32.vlgmr.msra.gmra.mxu1 %v117_v43 }
 0x196   :  { %v207_v48 = vpop.f32.mrf.mxu1 }
 0x197   :  { %v208_v49 = vadd.f32 %v323_v47, %v207_v48 }
 0x198   :  { %v421_v50 = vpop.f32.mrf.mxu1 }
 0x199   :  { %v211_v51 = vmax.f32 %v208_v49, 0.0 }
 0x19b   :  { %455 = vmatmul.mubr.f32.vlgmr.msra.gmra.mxu0 %v211_v51 }
 0x25b   :  { %v301_v53 = vpop.f32.mrf.mxu0 }
 0x25c   :  { %v302_v54 = vadd.f32 %v324_v52, %v301_v53 }
 0x25d   :  { %v456_v55 = vpop.f32.mrf.mxu0 }
 0x25e   :  { %306 = vst.msk [vmem:[#allocation2] sm:$0xff] %vm305_vm2, %v302_v54 }
 0x25f   :  { %471 = shalt.err (!%p468_p4)
}
 0x260   :  { %316 = dma.vmem_to_hbm [thread:$0]  %s314_s0, 128, %s713_s7, [#allocation3]  }
 0x261   :  { %480 = dma.done.wait [#allocation3], 128  }
 0x262   :  { %481 = vsyncadd [#allocation3], 4294967168 }
 0x263   :  { %320 = vsyncpa [#allocation3], 1 }

</bundles_post_ra>
